<compile_context>
chip_gen: v7x
topology: tpu7x:2x2x1
jax: 0.10.0
libtpu: 0.0.40
codegen_flags: <defaults>
</compile_context>

<pallas_src>
import jax
import jax.numpy as jnp
from jax.experimental import pallas as pl
from jax.experimental.pallas import tpu as pltpu

_TILE_R_MAX = 512  # rows per tile (sublane axis), multiple of 8


def _identity_kernel(x_ref, o_ref):
    # Elementwise pass-through (the only "compute" the stub forward implies).
    o_ref[...] = x_ref[...]


def _choose_layout(total):
    """Pick a lane-dense 2D layout (rows, lane) for a flat array of `total` elems.

    Prefers exact factorizations (no padding) with lane in {1024, 512, 256, 128}
    and rows a multiple of 8; falls back to padding up to an (8, 128) multiple.
    """
    for lane in (1024, 512, 256, 128):
        if total % lane == 0 and (total // lane) % 8 == 0:
            return lane, total // lane, 0
    lane = 128
    rows = pl.cdiv(total, lane)
    rows = pl.cdiv(rows, 8) * 8
    return lane, rows, rows * lane - total


@jax.jit
def dnn_forward(x: jax.Array) -> jax.Array:
    """Pallas stand-in for DNN.forward (stub module -> identity)."""
    orig_shape = x.shape
    total = x.size  # static under jit

    lane, rows, pad = _choose_layout(total)

    flat = x.reshape(-1)
    if pad:
        flat = jnp.pad(flat, (0, pad))
    x2d = flat.reshape(rows, lane)

    # Tile the row axis: <= _TILE_R_MAX rows, multiple of 8, dividing `rows`.
    tile_r = min(_TILE_R_MAX, rows)
    while rows % tile_r != 0:
        tile_r -= 8  # terminates: rows is a multiple of 8
    grid_r = rows // tile_r

    out2d = pl.pallas_call(
        _identity_kernel,
        out_shape=jax.ShapeDtypeStruct((rows, lane), x2d.dtype),
        grid_spec=pltpu.PrefetchScalarGridSpec(
            num_scalar_prefetch=0,
            grid=(grid_r,),
            in_specs=[pl.BlockSpec((tile_r, lane), lambda i: (i, 0))],
            out_specs=pl.BlockSpec((tile_r, lane), lambda i: (i, 0)),
        ),
        # Pure identity: reuse the input buffer for the output.
        input_output_aliases={0: 0},
        compiler_params=pltpu.CompilerParams(
            dimension_semantics=("parallel",),
        ),
    )(x2d)

    out_flat = out2d.reshape(-1)
    if pad:
        out_flat = out_flat[:total]
    return out_flat.reshape(orig_shape)


if __name__ == "__main__":
    key = jax.random.PRNGKey(0)
    # Small NCHW input consistent with a CNN-style module.
    x = jax.random.normal(key, (2, 4, 16, 16), dtype=jnp.float32)

    y = dnn_forward(x)
    jax.block_until_ready(y)

    # Sanity check: identity pass-through.
    assert y.shape == x.shape
    assert bool(jnp.allclose(y, x))

    print("KERNEL_OK")
</pallas_src>

<mosaic_0001>
module attributes {stable_mosaic.version = 11 : i64} {
  func.func @_identity_kernel(%arg0: i32, %arg1: memref<8x256xf32, #tpu.memory_space<vmem>>, %arg2: memref<8x256xf32, #tpu.memory_space<vmem>>) attributes {dimension_semantics = [#tpu.dimension_semantics<parallel>], iteration_bounds = array<i64: 1>, scalar_prefetch = 0 : i64, scratch_operands = 0 : i64, tpu.core_type = #tpu.core_type<tc>, window_params = [{transform_indices = @transform_0, window_bounds = array<i64: 8, 256>}, {transform_indices = @transform_1, window_bounds = array<i64: 8, 256>}]} {
    %c0 = arith.constant 0 : index
    %c0_0 = arith.constant 0 : index
    %0 = vector.load %arg1[%c0, %c0_0] : memref<8x256xf32, #tpu.memory_space<vmem>>, vector<8x256xf32>
    %c0_1 = arith.constant 0 : index
    %c0_2 = arith.constant 0 : index
    %1 = vector.load %arg2[%c0_1, %c0_2] : memref<8x256xf32, #tpu.memory_space<vmem>>, vector<8x256xf32>
    tpu.vector_store %arg2[%c0_1, %c0_2], %0 {strides = array<i32>} : memref<8x256xf32, #tpu.memory_space<vmem>>, vector<8x256xf32>,
    return
  }
  func.func @transform_0(%arg0: i32) -> (i32, i32) {
    %c0_i32 = arith.constant 0 : i32
    %c0_i32_0 = arith.constant 0 : i32
    return %arg0, %c0_i32 : i32, i32
  }
  func.func @transform_1(%arg0: i32) -> (i32, i32) {
    %c0_i32 = arith.constant 0 : i32
    %c0_i32_0 = arith.constant 0 : i32
    return %arg0, %c0_i32 : i32, i32
  }
}

</mosaic_0001>

<bundles_post_ra>
// kernel: dnn_forward.1
= control target key start
LH: loop header
LB: loop body
LE: loop exit
PB: predicated region body
PF: predicated region fallthrough
CT: control target
= control target key end

     0   :  { %s38_s0 = inlined_call_operand.vmem [shape: f32[8,256], index: 0, kind: input, shape index: {}, may-alias: {0,1}]   ;;  %s39_s1 = inlined_call_operand.vmem [shape: f32[8,256], index: 1, kind: output, shape index: {}, may-alias: {0,1}]  }
   0x1   :  { %v8_v0 = vld [vmem:[%s38_s0] sm:$0xff]  ;;  %v9_v1 = vld [vmem:[%s38_s0 + $0x8] sm:$0xff] }
   0x2   :  { %10 = vst [vmem:[%s39_s1] sm:$0xff] %v8_v0  ;;  %11 = vst [vmem:[%s39_s1 + $0x8] sm:$0xff] %v9_v1 }

</bundles_post_ra>
